<compile_context>
chip_gen: v7x
topology: tpu7x:2x2x1
jax: 0.10.0
libtpu: 0.0.40
codegen_flags: <defaults>
</compile_context>

<pallas_src>
import jax
import jax.numpy as jnp
from jax.experimental import pallas as pl
from jax.experimental.pallas import tpu as pltpu


def _round_up(x, m):
    return ((x + m - 1) // m) * m


# ----------------------------------------------------------------------------
# Kernel bodies.  One grid step == one stream.  Activation slab: (N*B, T*H).
# ----------------------------------------------------------------------------
def _stream_body(x, a, wp1, pe1, w2, pw, scale, shift, wfc, bfc):
    """One stream: (N*B, T*Cin) slab -> (B, Cpad) classifier partial.

    Matmul operands run in the weights' dtype (bf16 in production) with f32
    accumulation; ReLU / folded-BN / bias math stays f32.
    """
    f32 = jnp.float32
    cdt = wp1.dtype
    # layer 1 folded into the input projection: relu((A x)(Wp W1) + (A pe) W1)
    h = jnp.dot(a, x, preferred_element_type=f32)                      # (NB, T*Cin)
    h = jnp.dot(h.astype(cdt), wp1, preferred_element_type=f32) + pe1  # (NB, TH)
    h = jnp.maximum(h, 0.0)
    # layer 2 (stand-in graph conv): relu(A h W2)
    h = jnp.dot(a, h.astype(cdt), preferred_element_type=f32)
    h = jnp.dot(h.astype(cdt), w2, preferred_element_type=f32)
    h = jnp.maximum(h, 0.0)
    # node pooling -> (B, TH), then folded eval BatchNorm1d (+pool bias) + ReLU
    pooled = jnp.dot(pw, h.astype(cdt), preferred_element_type=f32)
    y = jnp.maximum(pooled * scale + shift, 0.0)
    # per-stream classifier partial (lane-padded to a full 128-lane vreg)
    return jnp.dot(y.astype(cdt), wfc, preferred_element_type=f32) + bfc


def _fused_kernel_accumulate(x_ref, a_ref, wp1_ref, pe1_ref, w2_ref, pw_ref,
                             scale_ref, shift_ref, wfc_ref, bfc_ref, o_ref):
    """Single-TC path: sum the two stream partials into one resident output."""
    out = _stream_body(x_ref[0], a_ref[...], wp1_ref[0], pe1_ref[0], w2_ref[0],
                       pw_ref[0], scale_ref[0], shift_ref[0],
                       wfc_ref[0], bfc_ref[0])

    @pl.when(pl.program_id(0) == 0)
    def _():
        o_ref[...] = jnp.zeros_like(o_ref)

    o_ref[...] += out.astype(o_ref.dtype)


def _fused_kernel_per_stream(x_ref, a_ref, wp1_ref, pe1_ref, w2_ref, pw_ref,
                             scale_ref, shift_ref, wfc_ref, bfc_ref, o_ref):
    """Megacore path: each core writes its own stream partial."""
    out = _stream_body(x_ref[0], a_ref[...], wp1_ref[0], pe1_ref[0], w2_ref[0],
                       pw_ref[0], scale_ref[0], shift_ref[0],
                       wfc_ref[0], bfc_ref[0])
    o_ref[0] = out.astype(o_ref.dtype)


# ----------------------------------------------------------------------------
# One-time parameter preparation (OFF the per-call hot path).
# ----------------------------------------------------------------------------
def prepare_params(params, A, batch_size, compute_dtype=jnp.bfloat16):
    """Builds the block-diagonal / folded operands the kernel consumes.

    Call once per (weights, A, batch_size); the result is reused by every
    forward call, so none of these XLA ops sit on the hot path.
    """
    f32 = jnp.float32
    B = batch_size
    N = A.shape[0]
    Cin, H = params["w_proj"].shape
    TH = params["bn_gamma"].shape[-1]
    T = TH // H
    C = params["fc_w"].shape[-1]
    Cpad = _round_up(max(C, 1), 128)

    eye_b = jnp.eye(B, dtype=f32)
    eye_t = jnp.eye(T, dtype=f32)

    # adjacency expanded over batch: rows/cols = n*B + b
    a_k = jnp.kron(A.astype(f32), eye_b)                               # (NB, NB)

    # fold multistream layer-1 weight into the input projection (valid because
    # ReLU only comes after W1):  Wp1[s] = w_proj @ ms_w1[s]
    wp1 = jnp.einsum("ch,sho->sco", params["w_proj"].astype(f32),
                     params["ms_w1"].astype(f32))                      # (2, Cin, H)
    wp1_k = jax.vmap(lambda w: jnp.kron(eye_t, w))(wp1)                # (2, T*Cin, TH)
    w1_k = jax.vmap(lambda w: jnp.kron(eye_t, w))(
        params["ms_w1"].astype(f32))                                   # (2, TH, TH)
    w2_k = jax.vmap(lambda w: jnp.kron(eye_t, w))(
        params["ms_w2"].astype(f32))                                   # (2, TH, TH)

    # positional encoding on the slab (rows n*B+b, lanes t*H+h), then folded
    # through A and W1:  pe1[s] = (A_k @ pe_k) @ W1_k[s]
    pe_k = jnp.tile(jnp.repeat(params["pe"].astype(f32), B, axis=0), (1, T))
    pe1 = jnp.einsum("nk,sko->sno", a_k @ pe_k, w1_k)                  # (2, NB, TH)

    # node pooling Linear(N,1) expanded over batch -> (2, B, N*B)
    pw_k = jax.vmap(lambda w: jnp.kron(w.astype(f32), eye_b))(params["pool_w"])

    # fold eval-mode BatchNorm1d + pooling bias:  y = pooled*scale + shift
    scale = params["bn_gamma"] * jax.lax.rsqrt(params["bn_var"] + 1e-5)
    shift = (params["pool_b"][:, None] - params["bn_mean"]) * scale \
        + params["bn_beta"]

    # classifier, zero-padded to a full 128-lane vreg (unmasked final store)
    fc_w = jnp.pad(params["fc_w"].astype(f32), ((0, 0), (0, 0), (0, Cpad - C)))
    fc_b = jnp.pad(params["fc_b"].astype(f32), ((0, 0), (0, 0), (0, Cpad - C)))

    return dict(
        a_k=a_k.astype(compute_dtype),
        wp1_k=wp1_k.astype(compute_dtype),
        pe1=pe1.astype(f32),
        w2_k=w2_k.astype(compute_dtype),
        pw_k=pw_k.astype(compute_dtype),
        scale=scale[:, None, :].astype(f32),                           # (2,1,TH)
        shift=shift[:, None, :].astype(f32),
        fc_w=fc_w.astype(compute_dtype),
        fc_b=fc_b.astype(f32),
    )


# ----------------------------------------------------------------------------
# Forward builder: the per-call hot path is ONLY slab-reshape + pallas_call.
# ----------------------------------------------------------------------------
def make_forward(N, T, Cin, H, C, B, accumulate_streams=True):
    NB, TCin, TH = N * B, T * Cin, T * H
    Cpad = _round_up(max(C, 1), 128)

    in_specs = [
        pl.BlockSpec((1, NB, TCin), lambda s: (s, 0, 0)),   # xs (per stream)
        pl.BlockSpec((NB, NB), lambda s: (0, 0)),           # A_k (shared)
        pl.BlockSpec((1, TCin, TH), lambda s: (s, 0, 0)),   # Wp@W1 block-diag
        pl.BlockSpec((1, NB, TH), lambda s: (s, 0, 0)),     # folded PE
        pl.BlockSpec((1, TH, TH), lambda s: (s, 0, 0)),     # W2 block-diag
        pl.BlockSpec((1, B, NB), lambda s: (s, 0, 0)),      # pool weight
        pl.BlockSpec((1, 1, TH), lambda s: (s, 0, 0)),      # BN scale
        pl.BlockSpec((1, 1, TH), lambda s: (s, 0, 0)),      # BN/bias shift
        pl.BlockSpec((1, TH, Cpad), lambda s: (s, 0, 0)),   # fc weight (padded)
        pl.BlockSpec((1, 1, Cpad), lambda s: (s, 0, 0)),    # fc bias (padded)
    ]

    if accumulate_streams:
        # single-TC chips: serial grid, accumulate both stream partials in VMEM
        call = pl.pallas_call(
            _fused_kernel_accumulate,
            out_shape=jax.ShapeDtypeStruct((B, Cpad), jnp.float32),
            grid=(2,),
            in_specs=in_specs,
            out_specs=pl.BlockSpec((B, Cpad), lambda s: (0, 0)),
            compiler_params=pltpu.CompilerParams(
                dimension_semantics=("arbitrary",)),
        )
    else:
        # megacore chips: one stream per TensorCore
        core_parallel = getattr(pltpu, "CORE_PARALLEL", "parallel")
        call = pl.pallas_call(
            _fused_kernel_per_stream,
            out_shape=jax.ShapeDtypeStruct((2, B, Cpad), jnp.float32),
            grid=(2,),
            in_specs=in_specs,
            out_specs=pl.BlockSpec((1, B, Cpad), lambda s: (s, 0, 0)),
            compiler_params=pltpu.CompilerParams(
                dimension_semantics=(core_parallel,)),
        )

    @jax.jit
    def forward(prepared, features):
        cdt = prepared["a_k"].dtype
        # per-stream slab: rows = n*B + b, lanes = t*Cin + c
        xs = jnp.stack([features[:, :, :N, :], features[:, :, N:, :]], axis=0)
        xs = xs.transpose(0, 3, 1, 2, 4).reshape(2, NB, TCin).astype(cdt)
        out = call(xs, prepared["a_k"], prepared["wp1_k"], prepared["pe1"],
                   prepared["w2_k"], prepared["pw_k"], prepared["scale"],
                   prepared["shift"], prepared["fc_w"], prepared["fc_b"])
        if not accumulate_streams:
            out = out[0] + out[1]          # fc[0](x1) + fc[1](x2)
        return out[:, :C]

    return forward


def _is_multi_tensorcore_chip():
    """True for chips that expose >1 TensorCore per jax device (v4/v5p/v7x)."""
    try:
        kind = jax.devices()[0].device_kind.lower()
    except Exception:
        return False
    return any(tag in kind for tag in ("v4", "v5p", "v7", "7x"))


# ----------------------------------------------------------------------------
# Pure-JAX reference of the same stand-in semantics (high precision).
# ----------------------------------------------------------------------------
def _reference_forward(params, features, A):
    hp = jax.lax.Precision.HIGHEST
    N = A.shape[0]
    feats = jnp.einsum("btvc,ch->btvh", features, params["w_proj"], precision=hp)
    feats = feats + jnp.tile(params["pe"], (2, 1))[None, None]
    streams = [feats[:, :, :N], feats[:, :, N:]]
    outs = []
    for s in range(2):
        h = streams[s]
        for w in (params["ms_w1"][s], params["ms_w2"][s]):
            h = jnp.einsum("nm,btmh->btnh", A, h, precision=hp)
            h = jnp.einsum("btnh,hk->btnk", h, w, precision=hp)
            h = jnp.maximum(h, 0.0)
        pooled = (jnp.einsum("btnh,n->bth", h, params["pool_w"][s, 0],
                             precision=hp) + params["pool_b"][s])
        Bb, T, H = pooled.shape
        flat = pooled.reshape(Bb, T * H)
        sc = params["bn_gamma"][s] * jax.lax.rsqrt(params["bn_var"][s] + 1e-5)
        y = (flat - params["bn_mean"][s]) * sc + params["bn_beta"][s]
        y = jnp.maximum(y, 0.0)
        outs.append(jnp.dot(y, params["fc_w"][s], precision=hp)
                    + params["fc_b"][s])
    return outs[0] + outs[1]


# ----------------------------------------------------------------------------
# Parameter construction
# ----------------------------------------------------------------------------
def make_params(key, in_dim, hidden, time_dim, num_nodes, num_classes):
    N, H, T, C = num_nodes, hidden, time_dim, num_classes
    ks = jax.random.split(key, 8)

    def xavier(k, shape):
        fan_in, fan_out = shape[-2], shape[-1]
        lim = (6.0 / (fan_in + fan_out)) ** 0.5
        return jax.random.uniform(k, shape, jnp.float32, -lim, lim)

    # deterministic sinusoidal PE stand-in (N, H); applied to both halves,
    # matching pos_encode.repeat(2, 1).
    pos = jnp.arange(N, dtype=jnp.float32)[:, None]
    dim = jnp.arange(H, dtype=jnp.float32)[None, :]
    pe = jnp.sin(pos / (10000.0 ** (dim / H)))

    return dict(
        w_proj=xavier(ks[0], (in_dim, H)),          # Linear(in_dim, H), no bias
        pe=pe,                                      # (N, H)
        ms_w1=xavier(ks[1], (2, H, H)),             # multistream1, per stream
        ms_w2=xavier(ks[2], (2, H, H)),             # multistream2, per stream
        pool_w=xavier(ks[3], (2, 1, N)),            # Linear(N, 1) weight/stream
        pool_b=jax.random.uniform(ks[4], (2,), jnp.float32, -0.1, 0.1),
        # BatchNorm1d(H*T) eval-mode stats / affine (PyTorch defaults)
        bn_gamma=jnp.ones((2, T * H), jnp.float32),
        bn_beta=jnp.zeros((2, T * H), jnp.float32),
        bn_mean=jnp.zeros((2, T * H), jnp.float32),
        bn_var=jnp.ones((2, T * H), jnp.float32),
        fc_w=xavier(ks[5], (2, T * H, C)),          # per-stream classifier
        fc_b=jnp.concatenate(
            [jax.random.uniform(ks[6], (1, 1, C), jnp.float32, -0.05, 0.05),
             jax.random.uniform(ks[7], (1, 1, C), jnp.float32, -0.05, 0.05)],
            axis=0),
    )


if __name__ == "__main__":
    # Small, module-consistent shapes.
    B, T, N = 2, 8, 25           # batch, time_dim, num_nodes
    in_dim, H, C = 4, 32, 10     # in_dim, hidden_size, num_classes

    key = jax.random.PRNGKey(0)
    k_feat, k_adj, k_par = jax.random.split(key, 3)

    features = jax.random.normal(k_feat, (B, T, 2 * N, in_dim), jnp.float32)
    A_raw = jax.random.uniform(k_adj, (N, N), jnp.float32)
    A = (A_raw + A_raw.T) * 0.5 + jnp.eye(N, dtype=jnp.float32)
    A = A / jnp.sum(A, axis=-1, keepdims=True)     # row-normalized adjacency

    params = make_params(k_par, in_dim, H, T, N, C)
    ref = _reference_forward(params, features, A)

    # --- 1) f32-weight pass with TIGHT tolerance: layout-bug detector --------
    fwd_acc = make_forward(N, T, in_dim, H, C, B, accumulate_streams=True)
    prep_f32 = prepare_params(params, A, B, compute_dtype=jnp.float32)
    out_f32 = jax.block_until_ready(fwd_acc(prep_f32, features))
    assert out_f32.shape == (B, C), out_f32.shape
    assert bool(jnp.all(jnp.isfinite(out_f32)))
    err_f32 = float(jnp.max(jnp.abs(out_f32 - ref)))
    assert bool(jnp.allclose(out_f32, ref, rtol=1e-2, atol=1e-1)), \
        f"f32 layout check failed, max abs err {err_f32}"

    # --- 2) production pass: bf16 MXU operands (one-time prep, reused) -------
    prep_bf16 = prepare_params(params, A, B, compute_dtype=jnp.bfloat16)
    if _is_multi_tensorcore_chip():
        try:
            fwd = make_forward(N, T, in_dim, H, C, B, accumulate_streams=False)
            out = jax.block_until_ready(fwd(prep_bf16, features))
        except Exception:
            # fall back to the single-TC accumulate path if core-parallel
            # lowering is unavailable in this jax/libtpu combination
            out = jax.block_until_ready(fwd_acc(prep_bf16, features))
    else:
        out = jax.block_until_ready(fwd_acc(prep_bf16, features))

    assert out.shape == (B, C), out.shape
    assert bool(jnp.all(jnp.isfinite(out)))
    # looser tolerance only absorbs bf16 operand rounding; layout correctness
    # was already enforced by the tight f32 check above
    assert bool(jnp.allclose(out, ref, rtol=1e-1, atol=1.0))
    print("KERNEL_OK")
</pallas_src>

<mosaic_0001>
module attributes {stable_mosaic.version = 11 : i64} {
  func.func @_fused_kernel_accumulate(%arg0: i32, %arg1: memref<1x50x32xf32, #tpu.memory_space<vmem>>, %arg2: memref<50x50xf32, #tpu.memory_space<vmem>>, %arg3: memref<1x32x256xf32, #tpu.memory_space<vmem>>, %arg4: memref<1x50x256xf32, #tpu.memory_space<vmem>>, %arg5: memref<1x256x256xf32, #tpu.memory_space<vmem>>, %arg6: memref<1x2x50xf32, #tpu.memory_space<vmem>>, %arg7: memref<1x1x256xf32, #tpu.memory_space<vmem>>, %arg8: memref<1x1x256xf32, #tpu.memory_space<vmem>>, %arg9: memref<1x256x128xf32, #tpu.memory_space<vmem>>, %arg10: memref<1x1x128xf32, #tpu.memory_space<vmem>>, %arg11: memref<2x128xf32, #tpu.memory_space<vmem>>) attributes {dimension_semantics = [#tpu.dimension_semantics<arbitrary>], iteration_bounds = array<i64: 2>, scalar_prefetch = 0 : i64, scratch_operands = 0 : i64, tpu.core_type = #tpu.core_type<tc>, window_params = [{transform_indices = @transform_0, window_bounds = array<i64: 1, 50, 32>}, {pipeline_mode = #tpu.pipeline_mode<synchronous>, transform_indices = @transform_1, window_bounds = array<i64: 50, 50>}, {transform_indices = @transform_2, window_bounds = array<i64: 1, 32, 256>}, {transform_indices = @transform_3, window_bounds = array<i64: 1, 50, 256>}, {transform_indices = @transform_4, window_bounds = array<i64: 1, 256, 256>}, {transform_indices = @transform_5, window_bounds = array<i64: 1, 2, 50>}, {transform_indices = @transform_6, window_bounds = array<i64: 1, 1, 256>}, {transform_indices = @transform_7, window_bounds = array<i64: 1, 1, 256>}, {transform_indices = @transform_8, window_bounds = array<i64: 1, 256, 128>}, {transform_indices = @transform_9, window_bounds = array<i64: 1, 1, 128>}, {pipeline_mode = #tpu.pipeline_mode<synchronous>, transform_indices = @transform_10, window_bounds = array<i64: 2, 128>}]} {
    %c0 = arith.constant 0 : index
    %c0_0 = arith.constant 0 : index
    %c0_1 = arith.constant 0 : index
    %0 = vector.load %arg1[%c0, %c0_0, %c0_1] : memref<1x50x32xf32, #tpu.memory_space<vmem>>, vector<1x50x32xf32>
    %1 = vector.shape_cast %0 : vector<1x50x32xf32> to vector<50x32xf32>
    %c0_2 = arith.constant 0 : index
    %c0_3 = arith.constant 0 : index
    %2 = vector.load %arg2[%c0_2, %c0_3] : memref<50x50xf32, #tpu.memory_space<vmem>>, vector<50x50xf32>
    %c0_4 = arith.constant 0 : index
    %c0_5 = arith.constant 0 : index
    %c0_6 = arith.constant 0 : index
    %3 = vector.load %arg3[%c0_4, %c0_5, %c0_6] : memref<1x32x256xf32, #tpu.memory_space<vmem>>, vector<1x32x256xf32>
    %4 = vector.shape_cast %3 : vector<1x32x256xf32> to vector<32x256xf32>
    %c0_7 = arith.constant 0 : index
    %c0_8 = arith.constant 0 : index
    %c0_9 = arith.constant 0 : index
    %5 = vector.load %arg4[%c0_7, %c0_8, %c0_9] : memref<1x50x256xf32, #tpu.memory_space<vmem>>, vector<1x50x256xf32>
    %6 = vector.shape_cast %5 : vector<1x50x256xf32> to vector<50x256xf32>
    %c0_10 = arith.constant 0 : index
    %c0_11 = arith.constant 0 : index
    %c0_12 = arith.constant 0 : index
    %7 = vector.load %arg5[%c0_10, %c0_11, %c0_12] : memref<1x256x256xf32, #tpu.memory_space<vmem>>, vector<1x256x256xf32>
    %8 = vector.shape_cast %7 : vector<1x256x256xf32> to vector<256x256xf32>
    %c0_13 = arith.constant 0 : index
    %c0_14 = arith.constant 0 : index
    %c0_15 = arith.constant 0 : index
    %9 = vector.load %arg6[%c0_13, %c0_14, %c0_15] : memref<1x2x50xf32, #tpu.memory_space<vmem>>, vector<1x2x50xf32>
    %10 = vector.shape_cast %9 : vector<1x2x50xf32> to vector<2x50xf32>
    %c0_16 = arith.constant 0 : index
    %c0_17 = arith.constant 0 : index
    %c0_18 = arith.constant 0 : index
    %11 = vector.load %arg7[%c0_16, %c0_17, %c0_18] : memref<1x1x256xf32, #tpu.memory_space<vmem>>, vector<1x1x256xf32>
    %12 = vector.shape_cast %11 : vector<1x1x256xf32> to vector<1x256xf32>
    %c0_19 = arith.constant 0 : index
    %c0_20 = arith.constant 0 : index
    %c0_21 = arith.constant 0 : index
    %13 = vector.load %arg8[%c0_19, %c0_20, %c0_21] : memref<1x1x256xf32, #tpu.memory_space<vmem>>, vector<1x1x256xf32>
    %14 = vector.shape_cast %13 : vector<1x1x256xf32> to vector<1x256xf32>
    %c0_22 = arith.constant 0 : index
    %c0_23 = arith.constant 0 : index
    %c0_24 = arith.constant 0 : index
    %15 = vector.load %arg9[%c0_22, %c0_23, %c0_24] : memref<1x256x128xf32, #tpu.memory_space<vmem>>, vector<1x256x128xf32>
    %16 = vector.shape_cast %15 : vector<1x256x128xf32> to vector<256x128xf32>
    %c0_25 = arith.constant 0 : index
    %c0_26 = arith.constant 0 : index
    %c0_27 = arith.constant 0 : index
    %17 = vector.load %arg10[%c0_25, %c0_26, %c0_27] : memref<1x1x128xf32, #tpu.memory_space<vmem>>, vector<1x1x128xf32>
    %18 = vector.shape_cast %17 : vector<1x1x128xf32> to vector<1x128xf32>
    %cst = arith.constant dense<0.000000e+00> : vector<50x32xf32>
    %19 = tpu.matmul %2, %1, %cst {dimension_numbers = #tpu.dot_dimension_numbers<[1], [0], [0], [1], [0, 0, 1, 1], [], []>} : vector<50x50xf32>, vector<50x32xf32>, vector<50x32xf32> -> vector<50x32xf32>
    %cst_28 = arith.constant dense<0.000000e+00> : vector<50x256xf32>
    %20 = tpu.matmul %19, %4, %cst_28 {dimension_numbers = #tpu.dot_dimension_numbers<[1], [0], [0], [1], [0, 0, 1, 1], [], []>} : vector<50x32xf32>, vector<32x256xf32>, vector<50x256xf32> -> vector<50x256xf32>
    %21 = arith.addf %20, %6 : vector<50x256xf32>
    %cst_29 = arith.constant 0.000000e+00 : f32
    %22 = vector.broadcast %cst_29 : f32 to vector<50x256xf32>
    %23 = arith.maximumf %21, %22 : vector<50x256xf32>
    %cst_30 = arith.constant dense<0.000000e+00> : vector<50x256xf32>
    %24 = tpu.matmul %2, %23, %cst_30 {dimension_numbers = #tpu.dot_dimension_numbers<[1], [0], [0], [1], [0, 0, 1, 1], [], []>} : vector<50x50xf32>, vector<50x256xf32>, vector<50x256xf32> -> vector<50x256xf32>
    %cst_31 = arith.constant dense<0.000000e+00> : vector<50x256xf32>
    %25 = tpu.matmul %24, %8, %cst_31 {dimension_numbers = #tpu.dot_dimension_numbers<[1], [0], [0], [1], [0, 0, 1, 1], [], []>} : vector<50x256xf32>, vector<256x256xf32>, vector<50x256xf32> -> vector<50x256xf32>
    %cst_32 = arith.constant 0.000000e+00 : f32
    %26 = vector.broadcast %cst_32 : f32 to vector<50x256xf32>
    %27 = arith.maximumf %25, %26 : vector<50x256xf32>
    %cst_33 = arith.constant dense<0.000000e+00> : vector<2x256xf32>
    %28 = tpu.matmul %10, %27, %cst_33 {dimension_numbers = #tpu.dot_dimension_numbers<[1], [0], [0], [1], [0, 0, 1, 1], [], []>} : vector<2x50xf32>, vector<50x256xf32>, vector<2x256xf32> -> vector<2x256xf32>
    %29 = vector.broadcast %12 : vector<1x256xf32> to vector<2x256xf32>
    %30 = arith.mulf %28, %29 : vector<2x256xf32>
    %31 = vector.broadcast %14 : vector<1x256xf32> to vector<2x256xf32>
    %32 = arith.addf %30, %31 : vector<2x256xf32>
    %cst_34 = arith.constant 0.000000e+00 : f32
    %33 = vector.broadcast %cst_34 : f32 to vector<2x256xf32>
    %34 = arith.maximumf %32, %33 : vector<2x256xf32>
    %cst_35 = arith.constant dense<0.000000e+00> : vector<2x128xf32>
    %35 = tpu.matmul %34, %16, %cst_35 {dimension_numbers = #tpu.dot_dimension_numbers<[1], [0], [0], [1], [0, 0, 1, 1], [], []>} : vector<2x256xf32>, vector<256x128xf32>, vector<2x128xf32> -> vector<2x128xf32>
    %36 = vector.broadcast %18 : vector<1x128xf32> to vector<2x128xf32>
    %37 = arith.addf %35, %36 : vector<2x128xf32>
    %c0_i32 = arith.constant 0 : i32
    %38 = arith.cmpi eq, %arg0, %c0_i32 : i32
    %39 = arith.extui %38 : i1 to i32
    %c0_i32_36 = arith.constant 0 : i32
    %40 = arith.cmpi ne, %39, %c0_i32_36 : i32
    scf.if %40 {
      %cst_41 = arith.constant 0.000000e+00 : f32
      %44 = vector.broadcast %cst_41 : f32 to vector<2x128xf32>
      %c0_42 = arith.constant 0 : index
      %c0_43 = arith.constant 0 : index
      %45 = vector.load %arg11[%c0_42, %c0_43] : memref<2x128xf32, #tpu.memory_space<vmem>>, vector<2x128xf32>
      tpu.vector_store %arg11[%c0_42, %c0_43], %44 {strides = array<i32>} : memref<2x128xf32, #tpu.memory_space<vmem>>, vector<2x128xf32>,
    } else {
    }
    %c0_37 = arith.constant 0 : index
    %c0_38 = arith.constant 0 : index
    %41 = vector.load %arg11[%c0_37, %c0_38] : memref<2x128xf32, #tpu.memory_space<vmem>>, vector<2x128xf32>
    %42 = arith.addf %41, %37 : vector<2x128xf32>
    %c0_39 = arith.constant 0 : index
    %c0_40 = arith.constant 0 : index
    %43 = vector.load %arg11[%c0_39, %c0_40] : memref<2x128xf32, #tpu.memory_space<vmem>>, vector<2x128xf32>
    tpu.vector_store %arg11[%c0_39, %c0_40], %42 {strides = array<i32>} : memref<2x128xf32, #tpu.memory_space<vmem>>, vector<2x128xf32>,
    return
  }
  func.func @transform_0(%arg0: i32) -> (i32, i32, i32) {
    %c0_i32 = arith.constant 0 : i32
    %c0_i32_0 = arith.constant 0 : i32
    %c0_i32_1 = arith.constant 0 : i32
    return %arg0, %c0_i32, %c0_i32_0 : i32, i32, i32
  }
  func.func @transform_1(%arg0: i32) -> (i32, i32) {
    %c0_i32 = arith.constant 0 : i32
    %c0_i32_0 = arith.constant 0 : i32
    %c0_i32_1 = arith.constant 0 : i32
    return %c0_i32, %c0_i32_0 : i32, i32
  }
  func.func @transform_2(%arg0: i32) -> (i32, i32, i32) {
    %c0_i32 = arith.constant 0 : i32
    %c0_i32_0 = arith.constant 0 : i32
    %c0_i32_1 = arith.constant 0 : i32
    return %arg0, %c0_i32, %c0_i32_0 : i32, i32, i32
  }
  func.func @transform_3(%arg0: i32) -> (i32, i32, i32) {
    %c0_i32 = arith.constant 0 : i32
    %c0_i32_0 = arith.constant 0 : i32
    %c0_i32_1 = arith.constant 0 : i32
    return %arg0, %c0_i32, %c0_i32_0 : i32, i32, i32
  }
  func.func @transform_4(%arg0: i32) -> (i32, i32, i32) {
    %c0_i32 = arith.constant 0 : i32
    %c0_i32_0 = arith.constant 0 : i32
    %c0_i32_1 = arith.constant 0 : i32
    return %arg0, %c0_i32, %c0_i32_0 : i32, i32, i32
  }
  func.func @transform_5(%arg0: i32) -> (i32, i32, i32) {
    %c0_i32 = arith.constant 0 : i32
    %c0_i32_0 = arith.constant 0 : i32
    %c0_i32_1 = arith.constant 0 : i32
    return %arg0, %c0_i32, %c0_i32_0 : i32, i32, i32
  }
  func.func @transform_6(%arg0: i32) -> (i32, i32, i32) {
    %c0_i32 = arith.constant 0 : i32
    %c0_i32_0 = arith.constant 0 : i32
    %c0_i32_1 = arith.constant 0 : i32
    return %arg0, %c0_i32, %c0_i32_0 : i32, i32, i32
  }
  func.func @transform_7(%arg0: i32) -> (i32, i32, i32) {
    %c0_i32 = arith.constant 0 : i32
    %c0_i32_0 = arith.constant 0 : i32
    %c0_i32_1 = arith.constant 0 : i32
    return %arg0, %c0_i32, %c0_i32_0 : i32, i32, i32
  }
  func.func @transform_8(%arg0: i32) -> (i32, i32, i32) {
    %c0_i32 = arith.constant 0 : i32
    %c0_i32_0 = arith.constant 0 : i32
    %c0_i32_1 = arith.constant 0 : i32
    return %arg0, %c0_i32, %c0_i32_0 : i32, i32, i32
  }
  func.func @transform_9(%arg0: i32) -> (i32, i32, i32) {
    %c0_i32 = arith.constant 0 : i32
    %c0_i32_0 = arith.constant 0 : i32
    %c0_i32_1 = arith.constant 0 : i32
    return %arg0, %c0_i32, %c0_i32_0 : i32, i32, i32
  }
  func.func @transform_10(%arg0: i32) -> (i32, i32) {
    %c0_i32 = arith.constant 0 : i32
    %c0_i32_0 = arith.constant 0 : i32
    %c0_i32_1 = arith.constant 0 : i32
    return %c0_i32, %c0_i32_0 : i32, i32
  }
}

</mosaic_0001>

<bundles_post_ra>
// kernel: forward.1
= control target key start
LH: loop header
LB: loop body
LE: loop exit
PB: predicated region body
PF: predicated region fallthrough
CT: control target
= control target key end

     0   :  { %15 = vsyncpa [#allocation3], 0  ;;  %s1852_s13 = smov 0   ;;  %s2163_s0 = inlined_call_operand.vmem [shape: f32[2,50,32], index: 0, kind: input, shape index: {}]   ;;  %s2164_s1 = inlined_call_operand.vmem [shape: f32[50,50], index: 1, kind: input, shape index: {}]   ;;  %s2165_s2 = inlined_call_operand.vmem [shape: f32[2,32,256], index: 2, kind: input, shape index: {}]   ;;  %s2166_s3 = inlined_call_operand.vmem [shape: f32[2,50,256], index: 3, kind: input, shape index: {}]   ;;  %s2167_s4 = inlined_call_operand.vmem [shape: f32[2,256,256], index: 4, kind: input, shape index: {}]   ;;  %s2168_s5 = inlined_call_operand.vmem [shape: f32[2,2,50], index: 5, kind: input, shape index: {}]   ;;  %s2169_s6 = inlined_call_operand.vmem [shape: f32[2,1,256], index: 6, kind: input, shape index: {}]   ;;  %s2170_s7 = inlined_call_operand.vmem [shape: f32[2,1,256], index: 7, kind: input, shape index: {}]   ;;  %s2171_s8 = inlined_call_operand.vmem [shape: f32[2,256,128], index: 8, kind: input, shape index: {}]   ;;  %s2172_s9 = inlined_call_operand.vmem [shape: f32[2,1,128], index: 9, kind: input, shape index: {}]   ;;  %s2173_s10 = inlined_call_operand.hbm [shape: f32[2,128], index: 10, kind: output, shape index: {}]  }
   0x1 LB: > { %s1858_s14 = sadd.s32 4294967295, %s1790_s13   ;;  %p1464_p0 = scmp.ge.s32.totalorder %s1790_s13, 1  ;;  %s1790_s13 = sphi %s1852_s13, %s21_s13  }
   0x2   : > { %p383_p1 = scmp.lt.s32.totalorder %s1790_s13, 3 }
   0x4   : > { %p384_p2 = pnand %p1464_p0, %p383_p1 }
   0x5   : > { %p451_p3 = scmp.lt.s32.totalorder (!%p384_p2), %s1858_s14, 1  ;;  %v1792_v0 = vmov (!%p384_p2), 0.0|0.0   ;;  %vm1793_vm0 = vmmov (!%p384_p2), 0   ;;  %v1794_v1 = vmov (!%p384_p2), 0.0   ;;  %vm649_vm1 = vcmask (!%p384_p2), 1041408   ;;  %v1890_v24 = vld [vmem:[%s2164_s1] sm:$0xff] (!%p384_p2) }
   0x6   : > { %387 = sbr.rel (%p384_p2) target bundleno = 1409 (0x581), region = 60  ;;  %1596 = vmatprep.subr.bf16.mxu0 (!%p384_p2), %v1792_v0  ;;  %1575 = vmatprep.mubr.msk.f32.mxu0 (!%p384_p2), %vm1793_vm0, %v1794_v1  ;;  %vm627_vm2 = vcmask (!%p384_p2), 408576   ;;  %v1900_v25 = vld [vmem:[%s2164_s1 + $0x8] sm:$0xff] (!%p384_p2)  ;;  %v1909_v26 = vld [vmem:[%s2164_s1 + $0x10] sm:$0xff] (!%p384_p2)  ;;  %v1918_v27 = vld [vmem:[%s2164_s1 + $0x18] sm:$0xff] (!%p384_p2)  ;;  %vm753_vm3 = vcmask (!%p384_p2), 261120  }
   0x7   : > { %839 = vmatprep.mubr.f32.mxu1 (!%p384_p2), %v1794_v1  ;;  %v1927_v28 = vld [vmem:[%s2164_s1 + $0x20] sm:$0xff] (!%p384_p2)  ;;  %v1936_v29 = vld [vmem:[%s2164_s1 + $0x28] sm:$0xff] (!%p384_p2)  ;;  %v1945_v30 = vld [vmem:[%s2164_s1 + $0x30] sm:$0x3] (!%p384_p2)  ;;  %p1504_p4 = scmp.ne.s32.totalorder (!%p384_p2), %s1858_s14, 0 }
   0xd   : > { %s1866_s15 = scalar_select %p451_p3, %s1858_s14, 1 }
   0xf   : > { %s1733_s16 = smul.u32 56, %s1866_s15  ;;  %s1509_s20 = sshll.u32 %s1866_s15, 6 }
  0x10   : > { %s460_s23 = scalar_lea.vmem %s2165_s2, %s1509_s20  ;;  %s1510_s21 = sshll.u32 %s1866_s15, 9 }
  0x11   : > { %s1873_s19 = scalar_lea.vmem %s2163_s0, %s1733_s16  ;;  %v506_v9 = vld [vmem:[%s460_s23 + $0x8] sm:$0xff]  ;;  %v508_v10 = vld [vmem:[%s460_s23 + $0x18] sm:$0xff]  ;;  %v505_v13 = vld [vmem:[%s460_s23] sm:$0xff]  ;;  %s1967_s24 = scalar_lea.vmem %s2167_s4, %s1510_s21 }
  0x12   : > { %v491_v2 = vld [vmem:[%s1873_s19] sm:$0xff]  ;;  %v492_v3 = vld [vmem:[%s1873_s19 + $0x8] sm:$0xff]  ;;  %v493_v4 = vld [vmem:[%s1873_s19 + $0x10] sm:$0xff]  ;;  %v1605_v12 = vpack.c.bf16 %v508_v10, %v506_v9  ;;  %s1734_s25 = smul.u32 112, %s1866_s15  ;;  %s1511_s29 = sshll.u32 %s1866_s15, 8 }
  0x13   : > { %v1597_v5 = vpack.c.bf16 %v492_v3, %v491_v2  ;;  %v494_v6 = vld [vmem:[%s1873_s19 + $0x18] sm:$0xff]  ;;  %v495_v7 = vld [vmem:[%s1873_s19 + $0x20] sm:$0xff]  ;;  %v496_v8 = vld [vmem:[%s1873_s19 + $0x28] sm:$0xff]  ;;  %s2080_s12 = scalar_lea.vmem %s2171_s8, %s1511_s29  ;;  %s2083_s16 = sshll.u32 %s1866_s15, 1 }
  0x14   : > { %v1600_v11 = vpack.c.bf16 %v494_v6, %v493_v4  ;;  %v507_v14 = vld [vmem:[%s460_s23 + $0x10] sm:$0xff]  ;;  %v510_v15 = vld [vmem:[%s460_s23 + $0x28] sm:$0xff]  ;;  %v512_v17 = vld [vmem:[%s460_s23 + $0x38] sm:$0xff]  ;;  %1606 = vmatprep.subr.bf16.mxu1 %v1605_v12  ;;  %v1603_v22 = vpack.c.bf16 %v496_v8, %v495_v7  ;;  %s2035_s28 = scalar_lea.vmem %s2166_s3, %s1734_s25  ;;  %s478_s22 = scalar_lea.vmem %s2169_s6, %s2083_s16 }
  0x15   : > { %1598 = vmatpush3.bf16.msra.mxu0 %v1597_v5  ;;  %v1607_v16 = vpack.c.bf16 %v507_v14, %v505_v13  ;;  %v509_v18 = vld [vmem:[%s460_s23 + $0x20] sm:$0xff]  ;;  %v511_v19 = vld [vmem:[%s460_s23 + $0x30] sm:$0xff]  ;;  %v1609_v20 = vpack.c.bf16 %v512_v17, %v510_v15  ;;  %v528_v45 = vld [vmem:[%s1967_s24 + $0x8] sm:$0xff]  ;;  %s482_s25 = scalar_lea.vmem %s2170_s7, %s2083_s16 }
  0x16   : > { %1599 = vmatprep.subr.bf16.mxu0 %v1792_v0  ;;  %v1611_v21 = vpack.c.bf16 %v511_v19, %v509_v18  ;;  %v497_v23 = vld [vmem:[%s1873_s19 + $0x30] sm:$0x3]  ;;  %v530_v46 = vld [vmem:[%s1967_s24 + $0x18] sm:$0xff]  ;;  %v527_v47 = vld [vmem:[%s1967_s24] sm:$0xff]  ;;  %s474_s19 = scalar_lea.vmem %s2168_s5, %s2083_s16 }
  0x17   : > { %1608 = vmatpush1.bf16.msra.mxu1 %v1607_v16  ;;  %v1625_v48 = vpack.c.bf16 %v530_v46, %v528_v45  ;;  %v529_v49 = vld [vmem:[%s1967_s24 + $0x10] sm:$0xff]  ;;  %v532_v50 = vld [vmem:[%s1967_s24 + $0x28] sm:$0xff]  ;;  %v534_v51 = vld [vmem:[%s1967_s24 + $0x38] sm:$0xff] }
  0x18   : > { %1610 = vmatprep.subr.bf16.mxu1 %v1609_v20  ;;  %v1627_v52 = vpack.c.bf16 %v529_v49, %v527_v47  ;;  %v1629_v53 = vpack.c.bf16 %v534_v51, %v532_v50  ;;  %v531_v54 = vld [vmem:[%s1967_s24 + $0x20] sm:$0xff]  ;;  %v533_v55 = vld [vmem:[%s1967_s24 + $0x30] sm:$0xff]  ;;  %v536_v56 = vld [vmem:[%s1967_s24 + $0x48] sm:$0xff] }
  0x19   : > { %1601 = vmatpush3.bf16.msra.mxu0 %v1600_v11  ;;  %v538_v57 = vld [vmem:[%s1967_s24 + $0x58] sm:$0xff]  ;;  %v1631_v58 = vpack.c.bf16 %v533_v55, %v531_v54  ;;  %v535_v60 = vld [vmem:[%s1967_s24 + $0x40] sm:$0xff]  ;;  %v537_v61 = vld [vmem:[%s1967_s24 + $0x50] sm:$0xff] }
  0x1a   : > { %1602 = vmatprep.subr.bf16.mxu0 %v1792_v0  ;;  %v1633_v59 = vpack.c.bf16 %v538_v57, %v536_v56  ;;  %v540_v62 = vld [vmem:[%s1967_s24 + $0x68] sm:$0xff]  ;;  %v542_v63 = vld [vmem:[%s1967_s24 + $0x78] sm:$0xff]  ;;  %v1635_v0 = vpack.c.bf16 %v537_v61, %v535_v60  ;;  %v539_v3 = vld [vmem:[%s1967_s24 + $0x60] sm:$0xff] }
  0x1b   : > { %1612 = vmatpush1.bf16.msra.mxu1 %v1611_v21  ;;  %v1637_v2 = vpack.c.bf16 %v542_v63, %v540_v62  ;;  %v541_v4 = vld [vmem:[%s1967_s24 + $0x70] sm:$0xff]  ;;  %v544_v5 = vld [vmem:[%s1967_s24 + $0x88] sm:$0xff]  ;;  %v546_v6 = vld [vmem:[%s1967_s24 + $0x98] sm:$0xff] }
  0x1c   : > { %v1639_v7 = vpack.c.bf16 %v541_v4, %v539_v3  ;;  %v1641_v8 = vpack.c.bf16 %v546_v6, %v544_v5  ;;  %v543_v9 = vld [vmem:[%s1967_s24 + $0x80] sm:$0xff]  ;;  %v545_v10 = vld [vmem:[%s1967_s24 + $0x90] sm:$0xff]  ;;  %v548_v11 = vld [vmem:[%s1967_s24 + $0xa8] sm:$0xff] }
  0x1d   : > { %1604 = vmatpush3.bf16.msra.mxu0 %v1603_v22  ;;  %v550_v12 = vld [vmem:[%s1967_s24 + $0xb8] sm:$0xff]  ;;  %v1643_v13 = vpack.c.bf16 %v545_v10, %v543_v9  ;;  %v547_v15 = vld [vmem:[%s1967_s24 + $0xa0] sm:$0xff]  ;;  %v549_v16 = vld [vmem:[%s1967_s24 + $0xb0] sm:$0xff] }
  0x1e   : > { %1573 = vmatprep.subr.mxu0 %v1794_v1  ;;  %v1645_v14 = vpack.c.bf16 %v550_v12, %v548_v11  ;;  %v552_v17 = vld [vmem:[%s1967_s24 + $0xc8] sm:$0xff]  ;;  %v554_v18 = vld [vmem:[%s1967_s24 + $0xd8] sm:$0xff]  ;;  %v1647_v19 = vpack.c.bf16 %v549_v16, %v547_v15  ;;  %v551_v21 = vld [vmem:[%s1967_s24 + $0xc0] sm:$0xff] }
  0x1f   : > { %v1649_v20 = vpack.c.bf16 %v554_v18, %v552_v17  ;;  %v553_v22 = vld [vmem:[%s1967_s24 + $0xd0] sm:$0xff]  ;;  %v563_v46 = vld [vmem:[%s1967_s24 + $0x120] sm:$0xff]  ;;  %v570_v49 = vld [vmem:[%s1967_s24 + $0x158] sm:$0xff] }
  0x20   : > { %v565_v47 = vld [vmem:[%s1967_s24 + $0x130] sm:$0xff]  ;;  %v572_v54 = vld [vmem:[%s1967_s24 + $0x168] sm:$0xff]  ;;  %v574_v55 = vld [vmem:[%s1967_s24 + $0x178] sm:$0xff] }
  0x21   : > { %1574 = vmatpush3.msk.msra.mxu0 %vm649_vm1, %v497_v23  ;;  %v556_v23 = vld [vmem:[%s1967_s24 + $0xe8] sm:$0xff]  ;;  %v1663_v50 = vpack.c.bf16 %v565_v47, %v563_v46  ;;  %v1669_v57 = vpack.c.bf16 %v574_v55, %v572_v54  ;;  %v578_v61 = vld [vmem:[%s1967_s24 + $0x198] sm:$0xff] }
  0x22   : > { %1576 = vmatmul.mubr.msk.f32.vlgmr.msra.gmra.mrb[0].mxu0 %vm627_vm2, %v1890_v24  ;;  %1626 = vmatprep.subr.bf16.mxu0 %v1625_v48  ;;  %v568_v48 = vld [vmem:[%s1967_s24 + $0x148] sm:$0xff]  ;;  %v582_v4 = vld [vmem:[%s1967_s24 + $0x1b8] sm:$0xff] }
  0x23   : > { %1578 = vmatprep.mubr.msk.f32.mxu0 %vm1793_vm0, %v1794_v1  ;;  %1628 = vmatpush1.bf16.msra.mxu0 %v1627_v52  ;;  %v1665_v51 = vpack.c.bf16 %v570_v49, %v568_v48  ;;  %v567_v52 = vld [vmem:[%s1967_s24 + $0x140] sm:$0xff]  ;;  %v576_v60 = vld [vmem:[%s1967_s24 + $0x188] sm:$0xff]  ;;  %v586_v10 = vld [vmem:[%s1967_s24 + $0x1d8] sm:$0xff] }
  0x24   : > { %1630 = vmatprep.subr.bf16.mxu0 %v1629_v53  ;;  %v569_v53 = vld [vmem:[%s1967_s24 + $0x150] sm:$0xff]  ;;  %v1673_v63 = vpack.c.bf16 %v578_v61, %v576_v60  ;;  %v580_v3 = vld [vmem:[%s1967_s24 + $0x1a8] sm:$0xff]  ;;  %v590_v16 = vld [vmem:[%s1967_s24 + $0x1f8] sm:$0xff] }
  0x25   : > { %v1667_v56 = vpack.c.bf16 %v569_v53, %v567_v52  ;;  %v1677_v6 = vpack.c.bf16 %v582_v4, %v580_v3  ;;  %v584_v9 = vld [vmem:[%s1967_s24 + $0x1c8] sm:$0xff]  ;;  %v519_v48 = vld [vmem:[%s2035_s28 + $0x30] sm:$0xff]  ;;  %v521_v60 = vld [vmem:[%s2035_s28 + $0x40] sm:$0xff] }
  0x26   : > { %1579 = vmatmul.mubr.msk.f32.gmra.mrb[2].mxu0 %vm627_vm2, %v1900_v25  ;;  %v1681_v12 = vpack.c.bf16 %v586_v10, %v584_v9  ;;  %v588_v15 = vld [vmem:[%s1967_s24 + $0x1e8] sm:$0xff]  ;;  %v523_v3 = vld [vmem:[%s2035_s28 + $0x50] sm:$0xff] }
  0x27   : > { %1581 = vmatprep.mubr.msk.f32.mxu0 %vm1793_vm0, %v1794_v1  ;;  %1632 = vmatpush1.bf16.msra.mxu0 %v1631_v58  ;;  %v571_v58 = vld [vmem:[%s1967_s24 + $0x160] sm:$0xff]  ;;  %v1685_v18 = vpack.c.bf16 %v590_v16, %v588_v15 }
  0x28   : > { %1634 = vmatprep.subr.bf16.mxu0 %v1633_v59  ;;  %v573_v59 = vld [vmem:[%s1967_s24 + $0x170] sm:$0xff]  ;;  %v525_v16 = vld [vmem:[%s2035_s28 + $0x60] sm:$0x3] }
  0x29   : > { %v1671_v62 = vpack.c.bf16 %v573_v59, %v571_v58 }
  0x2a   : > { %1582 = vmatmul.mubr.msk.f32.gmra.mrb[4].mxu0 %vm627_vm2, %v1909_v26 }
  0x2b   : > { %1584 = vmatprep.mubr.msk.f32.mxu0 %vm1793_vm0, %v1794_v1  ;;  %1636 = vmatpush1.bf16.msra.mxu0 %v1635_v0  ;;  %v575_v0 = vld [vmem:[%s1967_s24 + $0x180] sm:$0xff] }
  0x2c   : > { %1638 = vmatprep.subr.bf16.mxu0 %v1637_v2  ;;  %v577_v2 = vld [vmem:[%s1967_s24 + $0x190] sm:$0xff] }
  0x2d   : > { %v1675_v5 = vpack.c.bf16 %v577_v2, %v575_v0 }
  0x2e   : > { %1585 = vmatmul.mubr.msk.f32.gmra.mrb[6].mxu0 %vm627_vm2, %v1918_v27 }
  0x2f   : > { %1587 = vmatprep.mubr.msk.f32.mxu0 %vm1793_vm0, %v1794_v1  ;;  %1640 = vmatpush1.bf16.msra.mxu0 %v1639_v7  ;;  %v579_v7 = vld [vmem:[%s1967_s24 + $0x1a0] sm:$0xff] }
  0x30   : > { %1642 = vmatprep.subr.bf16.mxu0 %v1641_v8  ;;  %v581_v8 = vld [vmem:[%s1967_s24 + $0x1b0] sm:$0xff] }
  0x31   : > { %v1679_v11 = vpack.c.bf16 %v581_v8, %v579_v7 }
  0x32   : > { %1588 = vmatmul.mubr.msk.f32.gmra.mrb[8].mxu0 %vm627_vm2, %v1927_v28 }
  0x33   : > { %1590 = vmatprep.mubr.msk.f32.mxu0 %vm1793_vm0, %v1794_v1  ;;  %1644 = vmatpush1.bf16.msra.mxu0 %v1643_v13  ;;  %v583_v13 = vld [vmem:[%s1967_s24 + $0x1c0] sm:$0xff] }
  0x34   : > { %1646 = vmatprep.subr.bf16.mxu0 %v1645_v14  ;;  %v585_v14 = vld [vmem:[%s1967_s24 + $0x1d0] sm:$0xff] }
  0x35   : > { %v1683_v17 = vpack.c.bf16 %v585_v14, %v583_v13  ;;  %v526_v13 = vld [vmem:[%s2035_s28 + $0x68] sm:$0x3] }
  0x36   : > { %1591 = vmatmul.mubr.msk.f32.gmra.mrb[10].mxu0 %vm627_vm2, %v1936_v29 }
  0x37   : > { %1593 = vmatprep.mubr.msk.f32.mxu0 %vm1793_vm0, %v1794_v1  ;;  %1648 = vmatpush1.bf16.msra.mxu0 %v1647_v19  ;;  %v513_v19 = vld [vmem:[%s2035_s28] sm:$0xff] }
  0x38   : > { %1650 = vmatprep.subr.bf16.mxu0 %v1649_v20 }
  0x3a   : > { %1594 = vmatmul.mubr.msk.f32.gmra.mrb[12].mxu0 %vm627_vm2, %v1945_v30 }
  0xf5   : > { %v719_v31 = vpop.f32.mrb[0].mxu0 }
  0xf6   : > { %v1577_v32 = vpop.f32.mrb[1].mxu0  ;;  %1484 = vmatmul.mubr.msk.f32.vlgmr.msra.gmra.mrb[0].mxu1 %vm753_vm3, %v719_v31  ;;  %v558_v31 = vld [vmem:[%s1967_s24 + $0xf8] sm:$0xff] }
  0xf7   : > { %845 = vmatprep.mubr.f32.mxu1 %v1794_v1  ;;  %v1651_v32 = vpack.c.bf16 %v553_v22, %v551_v21  ;;  %v514_v21 = vld [vmem:[%s2035_s28 + $0x8] sm:$0xff] }
  0xf9   : > { %v724_v33 = vpop.f32.mrb[2].mxu0  ;;  %1652 = vmatpush1.bf16.msra.mxu0 %v1651_v32  ;;  %v516_v32 = vld [vmem:[%s2035_s28 + $0x18] sm:$0xff] }
  0xfa   : > { %v1580_v34 = vpop.f32.mrb[3].mxu0  ;;  %1485 = vmatmul.mubr.msk.f32.gmra.mrb[2].mxu1 %vm753_vm3, %v724_v33  ;;  %v1653_v33 = vpack.c.bf16 %v558_v31, %v556_v23  ;;  %v515_v23 = vld [vmem:[%s2035_s28 + $0x10] sm:$0xff] }
  0xfb   : > { %851 = vmatprep.mubr.f32.mxu1 %v1794_v1  ;;  %v555_v34 = vld [vmem:[%s1967_s24 + $0xe0] sm:$0xff] }
  0xfc   : > { %1654 = vmatprep.subr.bf16.mxu0 %v1653_v33 }
  0xfd   : > { %v729_v35 = vpop.f32.mrb[4].mxu0 }
  0xfe   : > { %v1583_v36 = vpop.f32.mrb[5].mxu0  ;;  %1486 = vmatmul.mubr.msk.f32.gmra.mrb[4].mxu1 %vm753_vm3, %v729_v35  ;;  %v557_v35 = vld [vmem:[%s1967_s24 + $0xf0] sm:$0xff] }
  0xff   : > { %857 = vmatprep.mubr.f32.mxu1 %v1794_v1  ;;  %v560_v36 = vld [vmem:[%s1967_s24 + $0x108] sm:$0xff] }
 0x101   : > { %v734_v37 = vpop.f32.mrb[6].mxu0 }
 0x102   : > { %v1586_v38 = vpop.f32.mrb[7].mxu0  ;;  %1487 = vmatmul.mubr.msk.f32.gmra.mrb[6].mxu1 %vm753_vm3, %v734_v37  ;;  %v562_v37 = vld [vmem:[%s1967_s24 + $0x118] sm:$0xff] }
 0x103   : > { %863 = vmatprep.mubr.f32.mxu1 %v1794_v1  ;;  %v1655_v38 = vpack.c.bf16 %v557_v35, %v555_v34 }
 0x105   : > { %v739_v39 = vpop.f32.mrb[8].mxu0  ;;  %1656 = vmatpush1.bf16.msra.mxu0 %v1655_v38 }
 0x106   : > { %v1589_v40 = vpop.f32.mrb[9].mxu0  ;;  %1488 = vmatmul.mubr.msk.f32.gmra.mrb[8].mxu1 %vm753_vm3, %v739_v39  ;;  %v1657_v39 = vpack.c.bf16 %v562_v37, %v560_v36 }
 0x107   : > { %869 = vmatprep.mubr.f32.mxu1 %v1794_v1  ;;  %v559_v40 = vld [vmem:[%s1967_s24 + $0x100] sm:$0xff] }
 0x108   : > { %1658 = vmatprep.subr.bf16.mxu0 %v1657_v39 }
 0x109   : > { %v744_v41 = vpop.f32.mrb[10].mxu0 }
 0x10a   : > { %v1592_v42 = vpop.f32.mrb[11].mxu0  ;;  %1489 = vmatmul.mubr.msk.f32.gmra.mrb[10].mxu1 %vm753_vm3, %v744_v41  ;;  %v561_v41 = vld [vmem:[%s1967_s24 + $0x110] sm:$0xff] }
 0x10b   : > { %875 = vmatprep.mubr.f32.mxu1 %v1794_v1  ;;  %v564_v42 = vld [vmem:[%s1967_s24 + $0x128] sm:$0xff] }
 0x10d   : > { %v749_v43 = vpop.f32.mrb[12].mxu0 }
 0x10e   : > { %v1595_v44 = vpop.f32.mrb[13].mxu0  ;;  %1490 = vmatmul.mubr.msk.f32.gmra.mrb[12].mxu1 %vm753_vm3, %v749_v43  ;;  %v566_v43 = vld [vmem:[%s1967_s24 + $0x138] sm:$0xff] }
 0x10f   : > { %966 = vmatprep.mubr.f32.mxu1 %v1794_v1  ;;  %v1659_v44 = vpack.c.bf16 %v561_v41, %v559_v40  ;;  %v1661_v45 = vpack.c.bf16 %v566_v43, %v564_v42  ;;  %v517_v42 = vld [vmem:[%s2035_s28 + $0x20] sm:$0xff] }
 0x111   : > { %1660 = vmatpush1.bf16.msra.mxu0 %v1659_v44 }
 0x112   : > { %1662 = vmatprep.subr.bf16.mxu0 %v1661_v45  ;;  %v518_v45 = vld [vmem:[%s2035_s28 + $0x28] sm:$0xff] }
 0x115   : > { %1664 = vmatpush1.bf16.msra.mxu0 %v1663_v50  ;;  %v520_v50 = vld [vmem:[%s2035_s28 + $0x38] sm:$0xff] }
 0x116   : > { %1666 = vmatprep.subr.bf16.mxu0 %v1665_v51 }
 0x119   : > { %1668 = vmatpush1.bf16.msra.mxu0 %v1667_v56 }
 0x11a   : > { %1670 = vmatprep.subr.bf16.mxu0 %v1669_v57 }
 0x11d   : > { %1672 = vmatpush1.bf16.msra.mxu0 %v1671_v62 }
 0x11e   : > { %1674 = vmatprep.subr.bf16.mxu0 %v1673_v63  ;;  %v522_v63 = vld [vmem:[%s2035_s28 + $0x48] sm:$0xff] }
 0x121   : > { %1676 = vmatpush1.bf16.msra.mxu0 %v1675_v5  ;;  %v524_v5 = vld [vmem:[%s2035_s28 + $0x58] sm:$0xff]  ;;  %s490_s28 = scalar_lea.vmem %s2172_s9, %s1866_s15 }
 0x122   : > { %1678 = vmatprep.subr.bf16.mxu0 %v1677_v6 }
 0x125   : > { %1680 = vmatpush1.bf16.msra.mxu0 %v1679_v11 }
 0x126   : > { %1682 = vmatprep.subr.bf16.mxu0 %v1681_v12 }
 0x129   : > { %1684 = vmatpush1.bf16.msra.mxu0 %v1683_v17 }
 0x12a   : > { %1686 = vmatprep.subr.bf16.mxu0 %v1685_v18 }
 0x1c9   : > { %v841_v20 = vpop.f32.mrb[0].mxu1 }
 0x1ca   : > { %v843_v22 = vpop.f32.mrb[1].mxu1  ;;  %v842_v31 = vadd.f32 %v841_v20, %v513_v19 }
 0x1cb   : > { %v844_v33 = vadd.f32 %v843_v22, %v514_v21 }
 0x1cc   : > { %v882_v38 = vmax.f32 %v842_v31, 0.0 }
 0x1cd   : > { %v847_v34 = vpop.f32.mrb[2].mxu1  ;;  %v883_v40 = vmax.f32 %v844_v33, 0.0 }
 0x1ce   : > { %v848_v35 = vadd.f32 %v847_v34, %v515_v23  ;;  %v849_v36 = vpop.f32.mrb[3].mxu1 }
 0x1cf   : > { %v850_v37 = vadd.f32 %v849_v36, %v516_v32 }
 0x1d0   : > { %v884_v39 = vmax.f32 %v848_v35, 0.0 }
 0x1d1   : > { %v885_v41 = vmax.f32 %v850_v37, 0.0  ;;  %v853_v43 = vpop.f32.mrb[4].mxu1 }
 0x1d2   : > { %v1615_v44 = vpack.c.bf16 %v884_v39, %v882_v38  ;;  %v855_v46 = vpop.f32.mrb[5].mxu1  ;;  %v854_v49 = vadd.f32 %v853_v43, %v517_v42 }
 0x1d3   : > { %v1613_v47 = vpack.c.bf16 %v885_v41, %v883_v40  ;;  %v856_v51 = vadd.f32 %v855_v46, %v518_v45 }
 0x1d4   : > { %v886_v56 = vmax.f32 %v854_v49, 0.0 }
 0x1d5   : > { %v859_v52 = vpop.f32.mrb[6].mxu1  ;;  %1614 = vmatprep.subr.bf16.mxu1 %v1613_v47  ;;  %v887_v58 = vmax.f32 %v856_v51, 0.0 }
 0x1d6   : > { %v860_v53 = vadd.f32 %v859_v52, %v519_v48  ;;  %v861_v54 = vpop.f32.mrb[7].mxu1  ;;  %1616 = vmatpush1.bf16.msra.mxu1 %v1615_v44 }
 0x1d7   : > { %v862_v55 = vadd.f32 %v861_v54, %v520_v50 }
 0x1d8   : > { %v888_v57 = vmax.f32 %v860_v53, 0.0 }
 0x1d9   : > { %v889_v59 = vmax.f32 %v862_v55, 0.0  ;;  %v865_v61 = vpop.f32.mrb[8].mxu1 }
 0x1da   : > { %v1619_v62 = vpack.c.bf16 %v888_v57, %v886_v56  ;;  %v867_v0 = vpop.f32.mrb[9].mxu1  ;;  %v866_v4 = vadd.f32 %v865_v61, %v521_v60 }
 0x1db   : > { %v1617_v2 = vpack.c.bf16 %v889_v59, %v887_v58  ;;  %v868_v6 = vadd.f32 %v867_v0, %v522_v63 }
 0x1dc   : > { %v890_v11 = vmax.f32 %v866_v4, 0.0 }
 0x1dd   : > { %v871_v7 = vpop.f32.mrb[10].mxu1  ;;  %1618 = vmatprep.subr.bf16.mxu1 %v1617_v2  ;;  %v891_v14 = vmax.f32 %v868_v6, 0.0 }
 0x1de   : > { %v872_v8 = vadd.f32 %v871_v7, %v523_v3  ;;  %v873_v9 = vpop.f32.mrb[11].mxu1  ;;  %1620 = vmatpush1.bf16.msra.mxu1 %v1619_v62 }
 0x1df   : > { %v874_v10 = vadd.f32 %v873_v9, %v524_v5 }
 0x1e0   : > { %v892_v12 = vmax.f32 %v872_v8, 0.0 }
 0x1e1   : > { %v893_v15 = vmax.f32 %v874_v10, 0.0  ;;  %v877_v17 = vpop.f32.mrb[12].mxu1  ;;  %v610_v10 = vld [vmem:[%s2080_s12 + $0x80] sm:$0xff] }
 0x1e2   : > { %v1623_v18 = vpack.c.bf16 %v892_v12, %v890_v11  ;;  %v879_v19 = vpop.f32.mrb[13].mxu1  ;;  %v878_v22 = vadd.f32 %v877_v17, %v525_v16  ;;  %v611_v11 = vld [vmem:[%s2080_s12 + $0x88] sm:$0xff]  ;;  %v613_v16 = vld [vmem:[%s2080_s12 + $0x98] sm:$0xff] }
 0x1e3   : > { %v1621_v20 = vpack.c.bf16 %v893_v15, %v891_v14  ;;  %v880_v21 = vadd.f32 %v879_v19, %v526_v13  ;;  %v594_v13 = vld [vmem:[%s2080_s12] sm:$0xff]  ;;  %v595_v14 = vld [vmem:[%s2080_s12 + $0x8] sm:$0xff]  ;;  %v612_v15 = vld [vmem:[%s2080_s12 + $0x90] sm:$0xff]  ;;  %v1701_v17 = vpack.c.bf16 %v611_v11, %v610_v10 }
 0x1e4   : > { %v894_v31 = vmax.f32 %v878_v22, 0.0  ;;  %v591_v19 = vld [vmem:[%s474_s19] sm:$0x3]  ;;  %v596_v22 = vld [vmem:[%s2080_s12 + $0x10] sm:$0xff] }
 0x1e5   : > { %v895_v23 = vmax.f32 %v880_v21, 0.0  ;;  %1622 = vmatprep.subr.bf16.mxu1 %v1621_v20  ;;  %v1703_v20 = vpack.c.bf16 %v595_v14, %v594_v13  ;;  %v1705_v21 = vpack.c.bf16 %v613_v16, %v612_v15  ;;  %v1503_v16 = vld [vmem:[%s490_s28] ss:$0 sm:$0xff] }
 0x1e6   : > { %1624 = vmatpush1.bf16.msra.mxu1 %v1623_v18 }
 0x1e7   : > { %1491 = vmatprep.subr.msk.mxu1 %vm649_vm1, %v895_v23  ;;  %v597_v23 = vld [vmem:[%s2080_s12 + $0x18] sm:$0xff] }
 0x1ea   : > { %1492 = vmatpush1.msk.msra.mxu1 %vm649_vm1, %v894_v31  ;;  %v614_v31 = vld [vmem:[%s2080_s12 + $0xa0] sm:$0xff] }
 0x1eb   : > { %1493 = vmatmul.mubr.msk.f32.vlgmr.msra.gmra.mrb[14].mxu1 %vm627_vm2, %v1890_v24  ;;  %v587_v24 = vld [vmem:[%s1967_s24 + $0x1e0] sm:$0xff] }
 0x1ec   : > { %972 = vmatprep.mubr.f32.mxu1 %v1794_v1 }
 0x1ef   : > { %1494 = vmatmul.mubr.msk.f32.gmra.mrb[16].mxu1 %vm627_vm2, %v1900_v25  ;;  %v589_v25 = vld [vmem:[%s1967_s24 + $0x1f0] sm:$0xff] }
 0x1f0   : > { %978 = vmatprep.mubr.f32.mxu1 %v1794_v1 }
 0x1f3   : > { %1495 = vmatmul.mubr.msk.f32.gmra.mrb[18].mxu1 %vm627_vm2, %v1909_v26  ;;  %v1687_v26 = vpack.c.bf16 %v589_v25, %v587_v24  ;;  %v615_v24 = vld [vmem:[%s2080_s12 + $0xa8] sm:$0xff]  ;;  %v1707_v25 = vpack.c.bf16 %v597_v23, %v596_v22 }
 0x1f4   : > { %984 = vmatprep.mubr.f32.mxu1 %v1794_v1 }
 0x1f5   : > { %1688 = vmatpush1.bf16.msra.mxu0 %v1687_v26  ;;  %v1709_v26 = vpack.c.bf16 %v615_v24, %v614_v31 }
 0x1f7   : > { %1496 = vmatmul.mubr.msk.f32.gmra.mrb[20].mxu1 %vm627_vm2, %v1918_v27 }
 0x1f8   : > { %990 = vmatprep.mubr.f32.mxu1 %v1794_v1 }
 0x1fb   : > { %1497 = vmatmul.mubr.msk.f32.gmra.mrb[22].mxu1 %vm627_vm2, %v1927_v28 }
 0x1fc   : > { %996 = vmatprep.mubr.f32.mxu1 %v1794_v1 }
 0x1ff   : > { %1498 = vmatmul.mubr.msk.f32.gmra.mrb[24].mxu1 %vm627_vm2, %v1936_v29 }
 0x200   : > { %1002 = vmatprep.mubr.f32.mxu1 %v1794_v1 }
 0x203   : > { %1499 = vmatmul.mubr.msk.f32.gmra.mrb[26].mxu1 %vm627_vm2, %v1945_v30 }
 0x204   : > { %1203 = vmatprep.mubr.f32.mxu1 %v1794_v1 }
 0x2be   : > { %v968_v27 = vpop.f32.mrb[14].mxu1 }
 0x2bf   : > { %v970_v32 = vpop.f32.mrb[15].mxu1 }
 0x2c0   : > { %1073 = vmatprep.mubr.f32.mxu0 %v970_v32  ;;  %v599_v32 = vld [vmem:[%s2080_s12 + $0x28] sm:$0xff] }
 0x2c1   : > { %1074 = vmatmul.mubr.f32.vlgmr.msra.gmra.mrb[14].mxu0 %v968_v27  ;;  %v598_v27 = vld [vmem:[%s2080_s12 + $0x20] sm:$0xff] }
 0x2c2   : > { %v974_v28 = vpop.f32.mrb[16].mxu1 }
 0x2c3   : > { %v976_v33 = vpop.f32.mrb[17].mxu1 }
 0x2c4   : > { %1079 = vmatprep.mubr.f32.mxu0 %v976_v33  ;;  %v617_v33 = vld [vmem:[%s2080_s12 + $0xb8] sm:$0xff] }
 0x2c5   : > { %1080 = vmatmul.mubr.f32.gmra.mrb[16].mxu0 %v974_v28  ;;  %v616_v28 = vld [vmem:[%s2080_s12 + $0xb0] sm:$0xff] }
 0x2c6   : > { %v980_v29 = vpop.f32.mrb[18].mxu1 }
 0x2c7   : > { %v982_v34 = vpop.f32.mrb[19].mxu1 }
 0x2c8   : > { %1085 = vmatprep.mubr.f32.mxu0 %v982_v34  ;;  %v1713_v34 = vpack.c.bf16 %v617_v33, %v616_v28 }
 0x2c9   : > { %1086 = vmatmul.mubr.f32.gmra.mrb[18].mxu0 %v980_v29  ;;  %v1711_v29 = vpack.c.bf16 %v599_v32, %v598_v27 }
 0x2ca   : > { %v986_v35 = vpop.f32.mrb[20].mxu1 }
 0x2cb   : > { %v988_v30 = vpop.f32.mrb[21].mxu1 }
 0x2cc   : > { %1091 = vmatprep.mubr.f32.mxu0 %v988_v30  ;;  %v601_v30 = vld [vmem:[%s2080_s12 + $0x38] sm:$0xff] }
 0x2cd   : > { %1092 = vmatmul.mubr.f32.gmra.mrb[20].mxu0 %v986_v35  ;;  %v600_v35 = vld [vmem:[%s2080_s12 + $0x30] sm:$0xff] }
 0x2ce   : > { %v992_v1 = vpop.f32.mrb[22].mxu1 }
 0x2cf   : > { %v994_v36 = vpop.f32.mrb[23].mxu1 }
 0x2d0   : > { %1097 = vmatprep.mubr.f32.mxu0 %v994_v36  ;;  %v619_v36 = vld [vmem:[%s2080_s12 + $0xc8] sm:$0xff] }
 0x2d1   : > { %1098 = vmatmul.mubr.f32.gmra.mrb[22].mxu0 %v992_v1  ;;  %v618_v1 = vld [vmem:[%s2080_s12 + $0xc0] sm:$0xff] }
 0x2d2   : > { %v998_v37 = vpop.f32.mrb[24].mxu1 }
 0x2d3   : > { %v1000_v38 = vpop.f32.mrb[25].mxu1 }
 0x2d4   : > { %1103 = vmatprep.mubr.f32.mxu0 %v1000_v38  ;;  %v1717_v38 = vpack.c.bf16 %v619_v36, %v618_v1 }
 0x2d5   : > { %1104 = vmatmul.mubr.f32.gmra.mrb[24].mxu0 %v998_v37  ;;  %v1715_v37 = vpack.c.bf16 %v601_v30, %v600_v35 }
 0x2d6   : > { %v1004_v39 = vpop.f32.mrb[26].mxu1 }
 0x2d7   : > { %v1006_v40 = vpop.f32.mrb[27].mxu1 }
 0x2d8   : > { %1109 = vmatprep.mubr.f32.mxu0 %v1006_v40  ;;  %v603_v40 = vld [vmem:[%s2080_s12 + $0x48] sm:$0xff] }
 0x2d9   : > { %1110 = vmatmul.mubr.f32.gmra.mrb[26].mxu0 %v1004_v39  ;;  %v602_v39 = vld [vmem:[%s2080_s12 + $0x40] sm:$0xff] }
 0x394   : > { %v1075_v41 = vpop.f32.mrb[14].mxu0 }
 0x395   : > { %v1077_v42 = vpop.f32.mrb[15].mxu0  ;;  %v1116_v44 = vmax.f32 %v1075_v41, 0.0  ;;  %v620_v41 = vld [vmem:[%s2080_s12 + $0xd0] sm:$0xff] }
 0x396   : > { %v1117_v47 = vmax.f32 %v1077_v42, 0.0  ;;  %v621_v42 = vld [vmem:[%s2080_s12 + $0xd8] sm:$0xff] }
 0x398   : > { %v1081_v43 = vpop.f32.mrb[16].mxu0 }
 0x399   : > { %v1118_v45 = vmax.f32 %v1081_v43, 0.0  ;;  %v1083_v46 = vpop.f32.mrb[17].mxu0  ;;  %v1719_v43 = vpack.c.bf16 %v603_v40, %v602_v39 }
 0x39a   : > { %v1119_v48 = vmax.f32 %v1083_v46, 0.0  ;;  %v605_v46 = vld [vmem:[%s2080_s12 + $0x58] sm:$0xff] }
 0x39b   : > { %v1691_v49 = vpack.c.bf16 %v1118_v45, %v1116_v44  ;;  %v1721_v44 = vpack.c.bf16 %v621_v42, %v620_v41  ;;  %v604_v45 = vld [vmem:[%s2080_s12 + $0x50] sm:$0xff] }
 0x39c   : > { %v1689_v50 = vpack.c.bf16 %v1119_v48, %v1117_v47  ;;  %v1087_v51 = vpop.f32.mrb[18].mxu0  ;;  %v1723_v47 = vpack.c.bf16 %v605_v46, %v604_v45  ;;  %v622_v48 = vld [vmem:[%s2080_s12 + $0xe0] sm:$0xff] }
 0x39d   : > { %v1089_v52 = vpop.f32.mrb[19].mxu0  ;;  %v1120_v54 = vmax.f32 %v1087_v51, 0.0  ;;  %v606_v51 = vld [vmem:[%s2080_s12 + $0x60] sm:$0xff] }
 0x39e   : > { %1690 = vmatprep.subr.bf16.mxu1 %v1689_v50  ;;  %v1121_v57 = vmax.f32 %v1089_v52, 0.0  ;;  %v607_v52 = vld [vmem:[%s2080_s12 + $0x68] sm:$0xff] }
 0x39f   : > { %1692 = vmatpush1.bf16.msra.mxu1 %v1691_v49  ;;  %v623_v49 = vld [vmem:[%s2080_s12 + $0xe8] sm:$0xff] }
 0x3a0   : > { %v1093_v53 = vpop.f32.mrb[20].mxu0  ;;  %v1725_v50 = vpack.c.bf16 %v623_v49, %v622_v48 }
 0x3a1   : > { %v1122_v55 = vmax.f32 %v1093_v53, 0.0  ;;  %v1095_v56 = vpop.f32.mrb[21].mxu0  ;;  %v1727_v53 = vpack.c.bf16 %v607_v52, %v606_v51 }
 0x3a2   : > { %v1123_v58 = vmax.f32 %v1095_v56, 0.0 }
 0x3a3   : > { %v1695_v59 = vpack.c.bf16 %v1122_v55, %v1120_v54  ;;  %v624_v54 = vld [vmem:[%s2080_s12 + $0xf0] sm:$0xff]  ;;  %v625_v55 = vld [vmem:[%s2080_s12 + $0xf8] sm:$0xff] }
 0x3a4   : > { %v1693_v60 = vpack.c.bf16 %v1123_v58, %v1121_v57  ;;  %v1099_v61 = vpop.f32.mrb[22].mxu0  ;;  %v1729_v56 = vpack.c.bf16 %v625_v55, %v624_v54  ;;  %v608_v57 = vld [vmem:[%s2080_s12 + $0x70] sm:$0xff]  ;;  %v609_v58 = vld [vmem:[%s2080_s12 + $0x78] sm:$0xff] }
 0x3a5   : > { %v1101_v62 = vpop.f32.mrb[23].mxu0  ;;  %v1124_v0 = vmax.f32 %v1099_v61, 0.0 }
 0x3a6   : > { %1694 = vmatprep.subr.bf16.mxu1 %v1693_v60  ;;  %v1125_v4 = vmax.f32 %v1101_v62, 0.0  ;;  %v1211_v60 = vlaneseq }
 0x3a7   : > { %1696 = vmatpush1.bf16.msra.mxu1 %v1695_v59  ;;  %v1731_v59 = vpack.c.bf16 %v609_v58, %v608_v57 }
 0x3a8   : > { %v1105_v63 = vpop.f32.mrb[24].mxu0  ;;  %v1212_v61 = vshrl.u32 %v1211_v60, 7 }
 0x3a9   : > { %v1126_v2 = vmax.f32 %v1105_v63, 0.0  ;;  %v1107_v3 = vpop.f32.mrb[25].mxu0  ;;  %v592_v63 = vld [vmem:[%s478_s22] sm:$0x3] }
 0x3aa   : > { %v1127_v5 = vmax.f32 %v1107_v3, 0.0  ;;  %v1213_v62 = vsub.s32 0, %v1212_v61 }
 0x3ab   : > { %v1699_v6 = vpack.c.bf16 %v1126_v2, %v1124_v0  ;;  %v1217_v0 = vsub.s32 1, %v1212_v61  ;;  %v593_v2 = vld [vmem:[%s482_s25] sm:$0x3] }
 0x3ac   : > { %v1697_v7 = vpack.c.bf16 %v1127_v5, %v1125_v4  ;;  %v1111_v8 = vpop.f32.mrb[26].mxu0  ;;  %v1214_v3 = vrot.slane %v592_v63, %v1213_v62  ;;  %v1227_v5 = vrot.slane %v593_v2, %v1213_v62 }
 0x3ad   : > { %v1113_v9 = vpop.f32.mrb[27].mxu0  ;;  %v1128_v18 = vmax.f32 %v1111_v8, 0.0  ;;  %v1218_v4 = vrot.slane %v592_v63, %v1217_v0 }
 0x3ae   : > { %1698 = vmatprep.subr.bf16.mxu1 %v1697_v7  ;;  %v1129_v12 = vmax.f32 %v1113_v9, 0.0  ;;  %v1231_v7 = vrot.slane %v593_v2, %v1217_v0 }
 0x3af   : > { %1700 = vmatpush1.bf16.msra.mxu1 %v1699_v6 }
 0x3b0   : > { %1500 = vmatprep.subr.msk.mxu1 %vm649_vm1, %v1129_v12 }
 0x3b3   : > { %1501 = vmatpush1.msk.msra.mxu1 %vm649_vm1, %v1128_v18 }
 0x3b4   : > { %1502 = vmatmul.mubr.msk.f32.vlgmr.msra.gmra.mrb[28].mxu1 %vm627_vm2, %v591_v19  ;;  %1702 = vmatprep.subr.bf16.mxu1 %v1701_v17 }
 0x3b5   : > { %1704 = vmatpush3.bf16.msra.mxu1 %v1703_v20  ;;  %v1795_v20 = vmov (!%p1504_p4), 0.0  }
 0x3b6   : > { %1706 = vmatprep.subr.bf16.mxu1 %v1705_v21  ;;  %1318 = vst [vmem:[#allocation2] sm:$0x3] (!%p1504_p4), %v1795_v20 }
 0x3b9   : > { %1708 = vmatpush3.bf16.msra.mxu1 %v1707_v25 }
 0x3ba   : > { %1710 = vmatprep.subr.bf16.mxu1 %v1709_v26 }
 0x3bd   : > { %1712 = vmatpush3.bf16.msra.mxu1 %v1711_v29 }
 0x3be   : > { %1714 = vmatprep.subr.bf16.mxu1 %v1713_v34 }
 0x3c1   : > { %1716 = vmatpush3.bf16.msra.mxu1 %v1715_v37 }
 0x3c2   : > { %1718 = vmatprep.subr.bf16.mxu1 %v1717_v38 }
 0x3c5   : > { %1720 = vmatpush3.bf16.msra.mxu1 %v1719_v43 }
 0x3c6   : > { %1722 = vmatprep.subr.bf16.mxu1 %v1721_v44 }
 0x3c9   : > { %1724 = vmatpush3.bf16.msra.mxu1 %v1723_v47 }
 0x3ca   : > { %1726 = vmatprep.subr.bf16.mxu1 %v1725_v50 }
 0x3cd   : > { %1728 = vmatpush3.bf16.msra.mxu1 %v1727_v53 }
 0x3ce   : > { %1730 = vmatprep.subr.bf16.mxu1 %v1729_v56 }
 0x3d1   : > { %1732 = vmatpush3.bf16.msra.mxu1 %v1731_v59 }
 0x487   : > { %v1205_v6 = vpop.f32.mrb[28].mxu1 }
 0x488   : > { %v1221_v8 = vmul.f32 %v1214_v3, %v1205_v6  ;;  %v1207_v9 = vpop.f32.mrb[29].mxu1 }
 0x489   : > { %v1222_v10 = vmul.f32 %v1218_v4, %v1207_v9 }
 0x48a   : > { %v1234_v11 = vadd.f32 %v1227_v5, %v1221_v8 }
 0x48b   : > { %v1235_v12 = vadd.f32 %v1231_v7, %v1222_v10 }
 0x48c   : > { %v1236_v14 = vmax.f32 %v1234_v11, 0.0 }
 0x48d   : > { %v1237_v13 = vmax.f32 %v1235_v12, 0.0 }
 0x48f   : > { %1308 = vmatprep.mubr.f32.mxu1 %v1237_v13 }
 0x490   : > { %1309 = vmatmul.mubr.f32.vlgmr.msra.gmra.mrb[30].mxu1 %v1236_v14 }
 0x561   : > { %1317 = sbr.rel (%p1504_p4) target bundleno = 1384 (0x568), region = 64 }
 0x563   : > { %v1558_v15 = vpop.f32.mrb[30].mxu1 }
 0x564   : > { %v1559_v17 = vpop.f32.mrb[31].mxu1 }
 0x565   : > { %v1560_v18 = vadd.f32 %v1559_v17, %v1558_v15 }
 0x567   : > { %v1311_v19 = vadd.f32 %v1560_v18, %v1503_v16 }
 0x568 PF: > { %v1319_v21 = vld [vmem:[#allocation2] sm:$0x3]  ;;  %p1739_p5 = scmp.eq.s32.totalorder %s1858_s14, 1  ;;  %s1796_s29 = smov [#allocation2]  }
 0x569   : > { %v1320_v22 = vadd.f32 %v1319_v21, %v1311_v19  ;;  %s1329_s30 = sshll.u32 %s1796_s29, 4  ;;  %s1330_s30 = int_to_ptr.vmem [resolvable:$true] %s1329_s30 }
 0x56a   : > { %s1754_s15 = scalar_lea.vmem %s1330_s30, 32  ;;  %p1761_p9 = scmp.lt.s32.totalorder %s1330_s30, %s1330_s30 }
 0x56b   : > { %1321 = vst [vmem:[#allocation2] sm:$0x3] %v1320_v22  ;;  %p1755_p6 = scmp.ne.s32.totalorder %s1330_s30, %s1754_s15  ;;  %p1762_p10 = scmp.lt.s32.totalorder %s1754_s15, %s1754_s15 }
 0x56d   : > { %p1756_p7 = pnand %p1755_p6, %p1739_p5  ;;  %p1763_p11 = por %p1762_p10, %p1761_p9 }
 0x56f   : > { %p1757_p8 = pneg %p1756_p7 }
 0x571   : > { %p1764_p12 = pnand %p1763_p11, %p1757_p8 }
 0x573   : > { %1767 = shalt.err (!%p1764_p12)
}
 0x574   : > { %s1768_s16 = scalar_lea.hbm %s2173_s10, 32 }
 0x575   : > { %p1769_p13 = scmp.ne.s32.totalorder %s2173_s10, %s1768_s16  ;;  %p1774_p2 = scmp.lt.u32.totalorder %s1768_s16, %s2173_s10 }
 0x577   : > { %p1770_p0 = pnand %p1769_p13, %p1739_p5 }
 0x579   : > { %p1771_p1 = pneg %p1770_p0 }
 0x57b   : > { %p1776_p3 = pnand %p1774_p2, %p1771_p1 }
 0x57d   : > { %1779 = shalt.err (!%p1776_p3)
}
 0x57e   : > { %1736 = dma.vmem_to_hbm [thread:$0]  (%p1739_p5), %s1330_s30, 32, %s2173_s10, [#allocation3]  }
 0x57f   : > { %1785 = dma.done.wait (%p1739_p5), [#allocation3], 32  }
 0x580   : > { %1787 = vsyncadd (%p1739_p5), [#allocation3], 4294967264 }
 0x581 PF: > { %s21_s13 = sadd.s32 1, %s1790_s13  }
 0x582   : > { %p18_p4 = scmp.ge.s32.totalorder %s21_s13, 4  }
 0x584   :  { %20 = sbr.rel (!%p18_p4) target bundleno = 1 (0x1), region = 115 }
 0x58b   :  { %1342 = vsyncpa [#allocation3], 1 }
 0x58c   :  { %1344 = vsyncpa [#allocation3 + $0x1], 1 }

</bundles_post_ra>
